<compile_context>
chip_gen: v6e
topology: v6e:2x2x1
jax: 0.10.0
libtpu: 0.0.40
codegen_flags: <defaults>
</compile_context>

<pallas_src>
import functools

import jax
import jax.numpy as jnp
from jax import lax
from jax.experimental import pallas as pl
from jax.experimental.pallas import tpu as pltpu

_LANES = 128
_SUBLANES = 8
_CHUNK_ROWS = 256   # rows processed per in-kernel accumulation step


def _round_up(a, b):
    return -(-a // b) * b


def _pow_gamma(base, gamma, log_base=None):
    """base**gamma with trace-time special cases (keeps EUP work low)."""
    if gamma == 0.0:
        return 1.0
    if gamma == 1.0:
        return base
    if gamma == 2.0:
        return base * base
    if gamma == 0.5:
        return jnp.sqrt(base)
    lb = jnp.log(base) if log_base is None else log_base
    return jnp.exp(gamma * lb)


def _bce_focal_kernel(x_ref, t_ref, o_ref, acc_ref, *, alpha, gamma,
                      binary_target, block_rows, chunk_rows, blocks_per_core,
                      splits, need_mask, last_block_row0, full_rows, tail):
    i = pl.program_id(1)

    @pl.when(i == 0)
    def _():
        acc_ref[...] = jnp.zeros_like(acc_ref)

    n_chunks = block_rows // chunk_rows

    def do_chunk(ci, masked):
        if isinstance(ci, int):
            r0 = ci * chunk_rows
        else:
            r0 = pl.multiple_of(ci * chunk_rows, chunk_rows)
        x = x_ref[pl.ds(r0, chunk_rows), :].astype(jnp.float32)
        t = t_ref[pl.ds(r0, chunk_rows), :].astype(jnp.float32)

        if binary_target:
            # Opt-in fast path for {0,1} targets: select the live branch first
            # -> 1 log + 1 pow per element instead of 2 logs + 2 pows.
            t_pos = t > 0.5
            x_sel = jnp.where(t_pos, x, 1.0 - x)
            w = jnp.where(t_pos, alpha, 1.0 - alpha)
            loss = -(w * _pow_gamma(1.0 - x_sel, gamma) * jnp.log(x_sel))
        else:
            log_x = jnp.log(x)
            log_1mx = jnp.log(1.0 - x)
            pow_1mx = _pow_gamma(1.0 - x, gamma, log_base=log_1mx)
            pow_x = _pow_gamma(x, gamma, log_base=log_x)
            loss = -(alpha * pow_1mx * t * log_x
                     + (1.0 - alpha) * pow_x * (1.0 - t) * log_1mx)

        if masked:
            # Only the final global block over-hangs / contains pad lanes.
            # Row-level comparisons (no int32 flat-index overflow).
            grow = (last_block_row0 + r0
                    + lax.broadcasted_iota(jnp.int32, loss.shape, 0))
            valid = grow < full_rows
            if tail:
                lane = lax.broadcasted_iota(jnp.int32, loss.shape, 1)
                valid = jnp.logical_or(
                    valid, jnp.logical_and(grow == full_rows, lane < tail))
            loss = jnp.where(valid, loss, 0.0)

        # (chunk_rows,128) -> (8,128) with pure sublane-aligned VPU adds.
        acc_ref[...] += loss.reshape(
            chunk_rows // _SUBLANES, _SUBLANES, _LANES).sum(axis=0)

    def accumulate(masked):
        if n_chunks == 1:
            do_chunk(0, masked)
        else:
            def body(ci, carry):
                do_chunk(ci, masked)
                return carry
            lax.fori_loop(0, n_chunks, body, 0)

    if need_mask:
        is_last = jnp.logical_and(pl.program_id(0) == splits - 1,
                                  i == blocks_per_core - 1)

        @pl.when(jnp.logical_not(is_last))
        def _():
            accumulate(False)

        @pl.when(is_last)
        def _():
            accumulate(True)
    else:
        accumulate(False)

    @pl.when(i == blocks_per_core - 1)
    def _():
        # Only a sublane reduce here; the cheap cross-lane reduce of the tiny
        # (splits,128) partials happens in glue.
        o_ref[...] = jnp.sum(acc_ref[...], axis=0, keepdims=True)


def _device_kind():
    try:
        return jax.devices()[0].device_kind.lower()
    except Exception:
        return ""


def bce_focal_loss(inputs, target, *, alpha=0.5, gamma=0.5, reduction="mean",
                   block_rows=None, num_core_splits=None, binary_target=False):
    assert reduction in ("mean", "sum")
    assert inputs.shape == target.shape

    kind = _device_kind()
    is_v7 = ("v7" in kind) or ("7x" in kind)
    if block_rows is None:
        if is_v7:
            block_rows = 8192          # 4 MiB/input tile, 16 MiB double-buffered
        elif "v6" in kind:
            block_rows = 4096          # 8 MiB double-buffered, 32 MiB scoped
        else:
            block_rows = 2048          # v5e: 16 MiB default scoped VMEM
    if num_core_splits is None:
        num_core_splits = 2 if is_v7 else 1   # dual TensorCore only on v7x

    total_n = int(inputs.size)
    tail = total_n % _LANES
    rows = -(-total_n // _LANES)               # cdiv

    x_flat = inputs.reshape(-1)
    t_flat = target.reshape(-1)
    if tail:
        # Rare path: element count not a multiple of 128.  Pad only to the
        # next lane boundary (<=127 elems); pad values give finite loss and
        # are masked out in the final block anyway.
        pad = _LANES - tail
        x_flat = jnp.pad(x_flat, (0, pad), constant_values=0.5)
        t_flat = jnp.pad(t_flat, (0, pad), constant_values=0.0)
    x2 = x_flat.reshape(rows, _LANES)          # copy-free when tail == 0
    t2 = t_flat.reshape(rows, _LANES)

    # Block rows: either one block covering everything (small arrays) or a
    # multiple of the in-kernel chunk size.  The last block may over-hang the
    # array end; Pallas clips the boundary DMA and the kernel masks it.
    if rows <= _CHUNK_ROWS:
        br = _round_up(rows, _SUBLANES)
        chunk_rows = br
    else:
        br = max(_CHUNK_ROWS, (int(block_rows) // _CHUNK_ROWS) * _CHUNK_ROWS)
        chunk_rows = _CHUNK_ROWS

    blocks = -(-rows // br)
    splits = int(num_core_splits)
    if splits < 1 or blocks < splits or blocks % splits != 0:
        splits = 1
    blocks_per_core = blocks // splits

    need_mask = (blocks * br != rows) or (tail != 0)

    kernel = functools.partial(
        _bce_focal_kernel,
        alpha=float(alpha),
        gamma=float(gamma),
        binary_target=bool(binary_target),
        block_rows=br,
        chunk_rows=chunk_rows,
        blocks_per_core=blocks_per_core,
        splits=splits,
        need_mask=bool(need_mask),
        last_block_row0=(blocks - 1) * br,
        full_rows=total_n // _LANES,
        tail=tail,
    )

    if splits > 1 and is_v7 and hasattr(pltpu, "CORE_PARALLEL"):
        dim_sem = (pltpu.CORE_PARALLEL, pltpu.ARBITRARY)
    elif splits > 1:
        dim_sem = ("parallel", "arbitrary")
    else:
        dim_sem = ("arbitrary", "arbitrary")

    partials = pl.pallas_call(
        kernel,
        out_shape=jax.ShapeDtypeStruct((splits, _LANES), jnp.float32),
        grid_spec=pltpu.PrefetchScalarGridSpec(
            num_scalar_prefetch=0,
            grid=(splits, blocks_per_core),
            in_specs=[
                pl.BlockSpec((br, _LANES),
                             lambda c, i: (c * blocks_per_core + i, 0)),
                pl.BlockSpec((br, _LANES),
                             lambda c, i: (c * blocks_per_core + i, 0)),
            ],
            out_specs=pl.BlockSpec((1, _LANES), lambda c, i: (c, 0)),
            scratch_shapes=[pltpu.VMEM((_SUBLANES, _LANES), jnp.float32)],
        ),
        compiler_params=pltpu.CompilerParams(dimension_semantics=dim_sem),
    )(x2, t2)

    total = jnp.sum(partials)
    if reduction == "mean":
        return total / jnp.float32(total_n)
    return total


def bce_focal_loss_ref(inputs, target, alpha=0.5, gamma=0.5, reduction="mean"):
    x = inputs.astype(jnp.float32)
    t = target.astype(jnp.float32)
    loss = -(alpha * jnp.power(1.0 - x, gamma) * t * jnp.log(x)
             + (1.0 - alpha) * jnp.power(x, gamma) * (1.0 - t)
             * jnp.log(1.0 - x))
    return jnp.mean(loss) if reduction == "mean" else jnp.sum(loss)


if __name__ == "__main__":
    key = jax.random.PRNGKey(0)
    k1, k2, k3, k4, k5, k6, k7, k8 = jax.random.split(key, 8)

    def mk(kx, kt, shape):
        x = jax.random.uniform(kx, shape, dtype=jnp.float32,
                               minval=0.05, maxval=0.95)
        t = (jax.random.uniform(kt, shape, dtype=jnp.float32) > 0.5
             ).astype(jnp.float32)
        return x, t

    # Test 1: NCHW (2,4,16,16), defaults (alpha=gamma=0.5, mean). 2048 elems ->
    # copy-free lane-dense reshape, single block, no mask path.
    x1, t1 = mk(k1, k2, (2, 4, 16, 16))
    out1 = jax.block_until_ready(bce_focal_loss(x1, t1))
    ref1 = bce_focal_loss_ref(x1, t1)
    assert jnp.allclose(out1, ref1, rtol=1e-5, atol=1e-6), (out1, ref1)

    # Test 2: odd shape (exercises minimal lane pad + last-block mask),
    # sum reduction, gamma=2.
    x2, t2 = mk(k3, k4, (3, 5, 17, 13))
    out2 = jax.block_until_ready(
        bce_focal_loss(x2, t2, alpha=0.25, gamma=2.0, reduction="sum"))
    ref2 = bce_focal_loss_ref(x2, t2, alpha=0.25, gamma=2.0, reduction="sum")
    assert jnp.allclose(out2, ref2, rtol=1e-5, atol=1e-4), (out2, ref2)

    # Test 3: larger input exercising multi-block accumulation, the in-kernel
    # chunked fori_loop, and the 2-way grid split (serial on 1-TC chips).
    x3, t3 = mk(k5, k6, (2, 8, 128, 128))   # 262144 elems -> 2048 rows
    out3 = jax.block_until_ready(
        bce_focal_loss(x3, t3, block_rows=512, num_core_splits=2))
    ref3 = bce_focal_loss_ref(x3, t3)
    assert jnp.allclose(out3, ref3, rtol=5e-5, atol=1e-5), (out3, ref3)

    # Test 4: ragged rows + over-hanging boundary block + multi-block grid,
    # plus the binary-target fast path (targets are 0/1).
    x4, t4 = mk(k7, k8, (300, 130))         # 39000 elems, tail of 88 lanes
    out4 = jax.block_until_ready(
        bce_focal_loss(x4, t4, block_rows=256, num_core_splits=2,
                       binary_target=True))
    ref4 = bce_focal_loss_ref(x4, t4)
    assert jnp.allclose(out4, ref4, rtol=5e-5, atol=1e-5), (out4, ref4)

    print("KERNEL_OK")
</pallas_src>

<mosaic_0001>
module attributes {stable_mosaic.version = 11 : i64} {
  func.func @_bce_focal_kernel(%arg0: i32, %arg1: i32, %arg2: memref<16x128xf32, #tpu.memory_space<vmem>>, %arg3: memref<16x128xf32, #tpu.memory_space<vmem>>, %arg4: memref<1x128xf32, #tpu.memory_space<vmem>>, %arg5: memref<8x128xf32, #tpu.memory_space<vmem>>) attributes {dimension_semantics = [#tpu.dimension_semantics<arbitrary>, #tpu.dimension_semantics<arbitrary>], iteration_bounds = array<i64: 1, 1>, scalar_prefetch = 0 : i64, scratch_operands = 1 : i64, tpu.core_type = #tpu.core_type<tc>, window_params = [{transform_indices = @transform_0, window_bounds = array<i64: 16, 128>}, {transform_indices = @transform_1, window_bounds = array<i64: 16, 128>}, {transform_indices = @transform_2, window_bounds = array<i64: 1, 128>}]} {
    %c0_i32 = arith.constant 0 : i32
    %0 = arith.cmpi eq, %arg1, %c0_i32 : i32
    %1 = arith.extui %0 : i1 to i32
    %c0_i32_0 = arith.constant 0 : i32
    %2 = arith.cmpi ne, %1, %c0_i32_0 : i32
    scf.if %2 {
      %cst_16 = arith.constant 0.000000e+00 : f32
      %34 = vector.broadcast %cst_16 : f32 to vector<8x128xf32>
      %c0_17 = arith.constant 0 : index
      %c0_18 = arith.constant 0 : index
      %35 = vector.load %arg5[%c0_17, %c0_18] : memref<8x128xf32, #tpu.memory_space<vmem>>, vector<8x128xf32>
      tpu.vector_store %arg5[%c0_17, %c0_18], %34 {strides = array<i32>} : memref<8x128xf32, #tpu.memory_space<vmem>>, vector<8x128xf32>,
    } else {
    }
    %c0 = arith.constant 0 : index
    %c0_1 = arith.constant 0 : index
    %3 = vector.load %arg2[%c0, %c0_1] : memref<16x128xf32, #tpu.memory_space<vmem>>, vector<16x128xf32>
    %c0_2 = arith.constant 0 : index
    %c0_3 = arith.constant 0 : index
    %4 = vector.load %arg3[%c0_2, %c0_3] : memref<16x128xf32, #tpu.memory_space<vmem>>, vector<16x128xf32>
    %5 = math.log %3 : vector<16x128xf32>
    %cst = arith.constant 1.000000e+00 : f32
    %6 = vector.broadcast %cst : f32 to vector<16x128xf32>
    %7 = arith.subf %6, %3 : vector<16x128xf32>
    %8 = math.log %7 : vector<16x128xf32>
    %cst_4 = arith.constant 1.000000e+00 : f32
    %9 = vector.broadcast %cst_4 : f32 to vector<16x128xf32>
    %10 = arith.subf %9, %3 : vector<16x128xf32>
    %11 = math.sqrt %10 : vector<16x128xf32>
    %12 = math.sqrt %3 : vector<16x128xf32>
    %cst_5 = arith.constant 5.000000e-01 : f32
    %13 = vector.broadcast %cst_5 : f32 to vector<16x128xf32>
    %14 = arith.mulf %13, %11 : vector<16x128xf32>
    %15 = arith.mulf %14, %4 : vector<16x128xf32>
    %16 = arith.mulf %15, %5 : vector<16x128xf32>
    %cst_6 = arith.constant 5.000000e-01 : f32
    %17 = vector.broadcast %cst_6 : f32 to vector<16x128xf32>
    %18 = arith.mulf %17, %12 : vector<16x128xf32>
    %cst_7 = arith.constant 1.000000e+00 : f32
    %19 = vector.broadcast %cst_7 : f32 to vector<16x128xf32>
    %20 = arith.subf %19, %4 : vector<16x128xf32>
    %21 = arith.mulf %18, %20 : vector<16x128xf32>
    %22 = arith.mulf %21, %8 : vector<16x128xf32>
    %23 = arith.addf %16, %22 : vector<16x128xf32>
    %cst_8 = arith.constant 0.000000e+00 : f32
    %24 = vector.broadcast %cst_8 : f32 to vector<16x128xf32>
    %25 = arith.subf %24, %23 : vector<16x128xf32>
    %c0_9 = arith.constant 0 : index
    %c0_10 = arith.constant 0 : index
    %26 = vector.load %arg5[%c0_9, %c0_10] : memref<8x128xf32, #tpu.memory_space<vmem>>, vector<8x128xf32>
    %27 = vector.shape_cast %25 : vector<16x128xf32> to vector<2x8x128xf32>
    %cst_11 = arith.constant dense<0.000000e+00> : vector<8x128xf32>
    %28 = vector.multi_reduction <add>, %27, %cst_11 [0] : vector<2x8x128xf32> to vector<8x128xf32>
    %29 = arith.addf %26, %28 : vector<8x128xf32>
    %c0_12 = arith.constant 0 : index
    %c0_13 = arith.constant 0 : index
    %30 = vector.load %arg5[%c0_12, %c0_13] : memref<8x128xf32, #tpu.memory_space<vmem>>, vector<8x128xf32>
    tpu.vector_store %arg5[%c0_12, %c0_13], %29 {strides = array<i32>} : memref<8x128xf32, #tpu.memory_space<vmem>>, vector<8x128xf32>,
    %c0_i32_14 = arith.constant 0 : i32
    %31 = arith.cmpi eq, %arg1, %c0_i32_14 : i32
    %32 = arith.extui %31 : i1 to i32
    %c0_i32_15 = arith.constant 0 : i32
    %33 = arith.cmpi ne, %32, %c0_i32_15 : i32
    scf.if %33 {
      %c0_16 = arith.constant 0 : index
      %c0_17 = arith.constant 0 : index
      %34 = vector.load %arg5[%c0_16, %c0_17] : memref<8x128xf32, #tpu.memory_space<vmem>>, vector<8x128xf32>
      %cst_18 = arith.constant dense<0.000000e+00> : vector<128xf32>
      %35 = vector.multi_reduction <add>, %34, %cst_18 [0] : vector<8x128xf32> to vector<128xf32>
      %36 = vector.shape_cast %35 : vector<128xf32> to vector<1x128xf32>
      %c0_19 = arith.constant 0 : index
      %c0_20 = arith.constant 0 : index
      %37 = vector.load %arg4[%c0_19, %c0_20] : memref<1x128xf32, #tpu.memory_space<vmem>>, vector<1x128xf32>
      tpu.vector_store %arg4[%c0_19, %c0_20], %36 {strides = array<i32>} : memref<1x128xf32, #tpu.memory_space<vmem>>, vector<1x128xf32>,
    } else {
    }
    return
  }
  func.func @transform_0(%arg0: i32, %arg1: i32) -> (i32, i32) {
    %c1_i32 = arith.constant 1 : i32
    %0 = arith.muli %arg0, %c1_i32 : i32
    %1 = arith.addi %0, %arg1 : i32
    %c0_i32 = arith.constant 0 : i32
    %c0_i32_0 = arith.constant 0 : i32
    return %1, %c0_i32 : i32, i32
  }
  func.func @transform_1(%arg0: i32, %arg1: i32) -> (i32, i32) {
    %c1_i32 = arith.constant 1 : i32
    %0 = arith.muli %arg0, %c1_i32 : i32
    %1 = arith.addi %0, %arg1 : i32
    %c0_i32 = arith.constant 0 : i32
    %c0_i32_0 = arith.constant 0 : i32
    return %1, %c0_i32 : i32, i32
  }
  func.func @transform_2(%arg0: i32, %arg1: i32) -> (i32, i32) {
    %c0_i32 = arith.constant 0 : i32
    %c0_i32_0 = arith.constant 0 : i32
    return %arg0, %c0_i32 : i32, i32
  }
}

</mosaic_0001>

<bundles_post_ra>
// kernel: tpu_custom_call.1
= control target key start
LH: loop header
LB: loop body
LE: loop exit
PB: predicated region body
PF: predicated region fallthrough
CT: control target
= control target key end

     0   :  { %7 = vsyncpa [#allocation4], 0  ;;  %s269_s0 = inlined_call_operand.hbm [shape: f32[16,128], index: 0, kind: input, shape index: {}]   ;;  %s270_s1 = inlined_call_operand.hbm [shape: f32[16,128], index: 1, kind: input, shape index: {}]   ;;  %s271_s2 = inlined_call_operand.hbm [shape: f32[1,128], index: 2, kind: output, shape index: {}]  }
   0x1   :  { %8 = vsyncpa [#allocation7], 0 }
   0x2   :  { %9 = vsyncpa [#allocation5], 0  ;;  %s235_s9 = smov [#allocation3]  }
   0x3   :  { %s19_s10 = sshll.u32 %s235_s9, 4  ;;  %s20_s10 = int_to_ptr.vmem [resolvable:$true] %s19_s10 }
   0x4   :  { %s177_s11 = scalar_lea.vmem %s20_s10, 256  ;;  %p182_p1 = scmp.lt.s32.totalorder %s20_s10, %s20_s10 }
   0x5   :  { %p178_p0 = scmp.ne.s32.totalorder %s20_s10, %s177_s11  ;;  %p183_p2 = scmp.lt.s32.totalorder %s177_s11, %s177_s11 }
   0x7   :  { %p184_p3 = por %p183_p2, %p182_p1 }
   0x9   :  { %p185_p4 = pnand %p184_p3, %p178_p0 }
   0xb   :  { %188 = shalt.err (!%p185_p4)
}
   0xc   :  { %s236_s12 = smov 128   ;;  %s237_s13 = smov 8  }
   0xd   :  { %25 = dma.hbm_to_vmem [thread:$0]  %s269_s0, 256, %s20_s10, [#allocation4], %s236_s12, %s236_s12, %s237_s13  }
   0xe   :  { %s238_s16 = smov [#allocation6]  }
   0xf   :  { %s35_s17 = sshll.u32 %s238_s16, 4  ;;  %s36_s17 = int_to_ptr.vmem [resolvable:$true] %s35_s17 }
  0x10   :  { %s197_s18 = scalar_lea.vmem %s36_s17, 256  ;;  %p202_p6 = scmp.lt.s32.totalorder %s36_s17, %s36_s17 }
  0x11   :  { %p198_p5 = scmp.ne.s32.totalorder %s36_s17, %s197_s18  ;;  %p203_p7 = scmp.lt.s32.totalorder %s197_s18, %s197_s18 }
  0x13   :  { %p204_p8 = por %p203_p7, %p202_p6 }
  0x15   :  { %p205_p9 = pnand %p204_p8, %p198_p5 }
  0x17   :  { %208 = shalt.err (!%p205_p9)
}
  0x18   :  { %41 = dma.hbm_to_vmem [thread:$0]  %s270_s1, 256, %s36_s17, [#allocation7], %s236_s12, %s236_s12, %s237_s13  }
  0x19   :  { %229 = dma.done.wait [#allocation4], 256  }
  0x1a   :  { %230 = vsyncadd [#allocation4], 4294967040 }
  0x1b   :  { %231 = dma.done.wait [#allocation7], 256  }
  0x1c   :  { %232 = vsyncadd [#allocation7], 4294967040  ;;  %v57_v0 = vld [vmem:[#allocation3] sm:$0xff]  ;;  %v58_v1 = vld [vmem:[#allocation3 + $0x8] sm:$0xff]  ;;  %s239_s0 = smov [#allocation8]  }
  0x1d   :  { %v65_v2 = vsub.f32 1.0, %v57_v0  ;;  %v66_v3 = vsub.f32 1.0, %v58_v1  ;;  %153 = vlog2.f32 %v57_v0  ;;  %vm87_vm0 = vcmp.eq.f32.partialorder %v57_v0, inf  ;;  %v59_v7 = vld [vmem:[#allocation6] sm:$0xff]  ;;  %v60_v11 = vld [vmem:[#allocation6 + $0x8] sm:$0xff]  ;;  %s138_s1 = sshll.u32 %s239_s0, 4  ;;  %s139_s1 = int_to_ptr.vmem [resolvable:$true] %s138_s1 }
  0x1e   :  { %155 = vlog2.f32 %v58_v1  ;;  %vm89_vm2 = vcmp.eq.f32.partialorder %v57_v0, 0.0  ;;  %v90_v9 = vand.u32 2147483648, %v57_v0  ;;  %vm94_vm6 = vcmp.eq.f32.partialorder %v58_v1, inf  ;;  %s209_s21 = scalar_lea.vmem %s139_s1, 16  ;;  %s213_s22 = scalar_lea.vmem %s139_s1, 32 }
  0x1f   :  { %157 = vrsqrt.f32 %v65_v2  ;;  %vm73_vm1 = vcmp.eq.f32.partialorder %v65_v2, inf  ;;  %v76_v8 = vand.u32 2147483648, %v65_v2  ;;  %vm75_vm3 = vcmp.eq.f32.partialorder %v65_v2, 0.0  ;;  %p210_p10 = scmp.ne.s32.totalorder %s139_s1, %s209_s21  ;;  %p214_p11 = scmp.lt.s32.totalorder %s139_s1, %s139_s1 }
  0x20   :  { %159 = vrsqrt.f32 %v66_v3  ;;  %vm80_vm4 = vcmp.eq.f32.partialorder %v66_v3, inf  ;;  %v83_v13 = vand.u32 2147483648, %v66_v3  ;;  %vm82_vm5 = vcmp.eq.f32.partialorder %v66_v3, 0.0  ;;  %p215_p12 = scmp.lt.s32.totalorder %s213_s22, %s209_s21 }
  0x21   :  { %161 = vrsqrt.f32 %v57_v0  ;;  %vm96_vm7 = vcmp.eq.f32.partialorder %v58_v1, 0.0  ;;  %v97_v19 = vand.u32 2147483648, %v58_v1  ;;  %v107_v20 = vsub.f32 1.0, %v59_v7 }
  0x22   :  { %163 = vrsqrt.f32 %v58_v1  ;;  %v108_v25 = vsub.f32 1.0, %v60_v11  ;;  %p216_p13 = por %p215_p12, %p214_p11 }
  0x23   :  { %165 = vlog2.f32 %v65_v2 }
  0x24   :  { %167 = vlog2.f32 %v66_v3  ;;  %p217_p0 = pnand %p216_p13, %p210_p10 }
  0x2a   :  { %v154_v4 = vpop.eup %153 }
  0x2b   :  { %v156_v5 = vpop.eup %155  ;;  %v62_v27 = vmul.f32 0.6931472, %v154_v4 }
  0x2c   :  { %v158_v6 = vpop.eup %157  ;;  %v64_v31 = vmul.f32 0.6931472, %v156_v5 }
  0x2d   :  { %v160_v10 = vpop.eup %159  ;;  %v72_v12 = vmul.f32 %v158_v6, %v65_v2 }
  0x2e   :  { %v162_v14 = vpop.eup %161  ;;  %v79_v15 = vmul.f32 %v160_v10, %v66_v3 }
  0x2f   :  { %v164_v16 = vpop.eup %163  ;;  %v74_v17 = vsel %vm73_vm1, %v65_v2, %v72_v12  ;;  %v86_v18 = vmul.f32 %v162_v14, %v57_v0 }
  0x30   :  { %v166_v21 = vpop.eup %165  ;;  %v77_v22 = vsel %vm75_vm3, %v76_v8, %v74_v17  ;;  %v81_v23 = vsel %vm80_vm4, %v66_v3, %v79_v15  ;;  %v93_v24 = vmul.f32 %v164_v16, %v58_v1 }
  0x31   :  { %v168_v26 = vpop.eup %167  ;;  %v84_v28 = vsel %vm82_vm5, %v83_v13, %v81_v23  ;;  %v88_v29 = vsel %vm87_vm0, %v57_v0, %v86_v18  ;;  %v99_v30 = vmul.f32 0.5, %v77_v22  ;;  %v68_v35 = vmul.f32 0.6931472, %v166_v21 }
  0x32   :  { %v91_v32 = vsel %vm89_vm2, %v90_v9, %v88_v29  ;;  %v95_v33 = vsel %vm94_vm6, %v58_v1, %v93_v24  ;;  %v100_v34 = vmul.f32 0.5, %v84_v28  ;;  %v70_v39 = vmul.f32 0.6931472, %v168_v26 }
  0x33   :  { %v98_v36 = vsel %vm96_vm7, %v97_v19, %v95_v33  ;;  %v101_v37 = vmul.f32 %v99_v30, %v59_v7  ;;  %v105_v38 = vmul.f32 0.5, %v91_v32 }
  0x34   :  { %v102_v40 = vmul.f32 %v100_v34, %v60_v11  ;;  %v106_v41 = vmul.f32 0.5, %v98_v36 }
  0x35   :  { %v103_v42 = vmul.f32 %v101_v37, %v62_v27  ;;  %v109_v43 = vmul.f32 %v107_v20, %v105_v38 }
  0x36   :  { %v104_v44 = vmul.f32 %v102_v40, %v64_v31  ;;  %v110_v45 = vmul.f32 %v108_v25, %v106_v41 }
  0x37   :  { %v111_v46 = vmul.f32 %v109_v43, %v68_v35 }
  0x38   :  { %v112_v47 = vmul.f32 %v110_v45, %v70_v39 }
  0x39   :  { %v113_v48 = vadd.f32 %v111_v46, %v103_v42 }
  0x3a   :  { %v114_v49 = vadd.f32 %v112_v47, %v104_v44 }
  0x3b   :  { %v115_v50 = vsub.f32 0.0, %v113_v48 }
  0x3c   :  { %v116_v51 = vsub.f32 0.0, %v114_v49 }
  0x3e   :  { %v118_v52 = vadd.f32 %v116_v51, %v115_v50 }
  0x40   :  { %v125_v53 = vrot.slane %v118_v52, 4 }
  0x42   :  { %v126_v54 = vadd.f32 %v125_v53, %v118_v52 }
  0x44   :  { %v127_v55 = vrot.slane %v126_v54, 2 }
  0x46   :  { %v128_v56 = vadd.f32 %v127_v55, %v126_v54 }
  0x48   :  { %v129_v57 = vrot.slane %v128_v56, 1 }
  0x4a   :  { %v130_v58 = vadd.f32 %v129_v57, %v128_v56 }
  0x4c   :  { %131 = vst [vmem:[#allocation8] sm:$0x1] %v130_v58 }
  0x4d   :  { %220 = shalt.err (!%p217_p0)
}
  0x4e   :  { %141 = dma.vmem_to_hbm [thread:$0]  %s139_s1, 16, %s271_s2, [#allocation5]  }
  0x4f   :  { %233 = dma.done.wait [#allocation5], 16  }
  0x50   :  { %234 = vsyncadd [#allocation5], 4294967280 }
  0x51   :  { %145 = vsyncpa [#allocation4], 1 }
  0x52   :  { %146 = vsyncpa [#allocation7], 1 }
  0x53   :  { %147 = vsyncpa [#allocation5], 1 }

</bundles_post_ra>
